<compile_context>
chip_gen: v7x
topology: tpu7x:2x2x1
jax: 0.10.0
libtpu: 0.0.40
codegen_flags: <defaults>
</compile_context>

<pallas_src>
import jax
import jax.numpy as jnp
from jax.experimental import pallas as pl
from jax.experimental.pallas import tpu as pltpu


def _round_up(x, m):
    return ((x + m - 1) // m) * m


# ----------------------------------------------------------------------------
# Fused kernel (one (batch, row-tile) grid step):
#   out = SiLU(x @ Wa + bias_a[b]) @ Wb + bias_b
#   image path : Wa = blockdiag_w(enc_w @ w1), Wb = blockdiag_w(w2 @ dec_w)
#   latent path: Wa = blockdiag_w(w1),         Wb = blockdiag_w(w2)
#   bias_a[b] already contains the folded time projection for batch b.
# ----------------------------------------------------------------------------
def _fused_mlp_kernel(x_ref, ba_ref, wa_ref, wb_ref, bb_ref, o_ref):
    xw = x_ref[...].astype(wa_ref.dtype)                        # bf16 for MXU
    pre = (jnp.dot(xw, wa_ref[...], preferred_element_type=jnp.float32)
           + ba_ref[...])                                       # f32
    act = pre * jax.nn.sigmoid(pre)                             # SiLU in f32
    y = (jnp.dot(act.astype(wb_ref.dtype), wb_ref[...],
                 preferred_element_type=jnp.float32) + bb_ref[...])
    o_ref[...] = y.astype(o_ref.dtype)


def pallas_fused_mlp(x_rows, bias_a, wa, wb, bias_b, *, max_tile_rows=512):
    """x_rows: (B, Hr, K), bias_a: (B, 1, Nh), wa: (K, Nh), wb: (Nh, N),
    bias_b: (1, N) -> (B, Hr, N) f32."""
    B, Hr, K = x_rows.shape
    Nh = wa.shape[1]
    N = wb.shape[1]
    tile = min(max_tile_rows, _round_up(Hr, 8))
    Hp = _round_up(Hr, tile)
    if Hp != Hr:  # pad ragged row counts instead of asserting divisibility
        x_rows = jnp.pad(x_rows, ((0, 0), (0, Hp - Hr), (0, 0)))

    out = pl.pallas_call(
        _fused_mlp_kernel,
        out_shape=jax.ShapeDtypeStruct((B, Hp, N), jnp.float32),
        grid_spec=pltpu.PrefetchScalarGridSpec(
            num_scalar_prefetch=0,
            grid=(B, Hp // tile),
            in_specs=[
                pl.BlockSpec((None, tile, K), lambda b, i: (b, i, 0)),   # rows
                pl.BlockSpec((None, 1, Nh), lambda b, i: (b, 0, 0)),     # bias_a+tproj (per batch)
                pl.BlockSpec((K, Nh), lambda b, i: (0, 0)),              # Wa (resident)
                pl.BlockSpec((Nh, N), lambda b, i: (0, 0)),              # Wb (resident)
                pl.BlockSpec((1, N), lambda b, i: (0, 0)),               # bias_b
            ],
            out_specs=pl.BlockSpec((None, tile, N), lambda b, i: (b, i, 0)),
        ),
        compiler_params=pltpu.CompilerParams(
            dimension_semantics=("parallel", "parallel"),
        ),
    )(x_rows, bias_a, wa, wb, bias_b)
    return out[:, :Hr] if Hp != Hr else out


def _ref_fused_mlp(x_rows, bias_a, wa, wb, bias_b):
    """Plain-JAX reference of the kernel math (same packed bf16 weights)."""
    pre = (jnp.dot(x_rows.astype(wa.dtype), wa,
                   preferred_element_type=jnp.float32) + bias_a)
    act = pre * jax.nn.sigmoid(pre)
    return (jnp.dot(act.astype(wb.dtype), wb,
                    preferred_element_type=jnp.float32) + bias_b)


# ----------------------------------------------------------------------------
# Host-side glue: time embedding, block-diagonal lane packing, model wrapper
# ----------------------------------------------------------------------------
def timestep_embedding(t, dim):
    half = dim // 2
    freqs = jnp.exp(-jnp.log(10000.0) * jnp.arange(half, dtype=jnp.float32) / half)
    args = t.astype(jnp.float32)[:, None] * freqs[None, :]
    return jnp.concatenate([jnp.sin(args), jnp.cos(args)], axis=-1)   # (B, dim)


def _pack_blockdiag(wa, ba, wb, bb, g, wdtype=jnp.bfloat16):
    """Pack g spatial positions into the lane axis: W -> kron(I_g, W)."""
    eye = jnp.eye(g, dtype=jnp.float32)
    return (jnp.kron(eye, wa).astype(wdtype),
            jnp.tile(ba, (1, g)).astype(jnp.float32),
            jnp.kron(eye, wb).astype(wdtype),
            jnp.tile(bb, (1, g)).astype(jnp.float32))


class LatentDiffusionModelPallas:
    """Synthetic LatentDiffusionModel:
         encoder  = 2x2/stride-2 patchify conv  (linear on 2x2 patches)
         noise_pred_net = time-conditioned 2-layer 1x1-conv MLP (SiLU)
         decoder  = 2x2 unpatchify conv
       forward(x, t) follows the PyTorch dispatch:
         image input  -> decode(noise_pred(encode(x), t))   [one fused kernel]
         latent input -> noise_pred(x, t)                   [same fused kernel]
    """

    def __init__(self, latent_channels, img_size, in_channels,
                 hidden=32, time_emb_dim=16, seed=0):
        self.latent_channels = latent_channels
        self.img_size = img_size
        self.in_channels = in_channels
        self.hidden = hidden
        self.time_emb_dim = time_emb_dim

        key = jax.random.PRNGKey(seed)
        ks = jax.random.split(key, 8)
        s = 0.05
        patch_in = in_channels * 4                         # 2x2 patches
        self.enc_w = s * jax.random.normal(ks[0], (patch_in, latent_channels), jnp.float32)
        self.enc_b = jnp.zeros((1, latent_channels), jnp.float32)
        self.dec_w = s * jax.random.normal(ks[1], (latent_channels, patch_in), jnp.float32)
        self.dec_b = jnp.zeros((1, patch_in), jnp.float32)
        self.wt = s * jax.random.normal(ks[2], (time_emb_dim, hidden), jnp.float32)
        self.bt = jnp.zeros((1, hidden), jnp.float32)
        self.w1 = s * jax.random.normal(ks[3], (latent_channels, hidden), jnp.float32)
        self.b1 = jnp.zeros((1, hidden), jnp.float32)
        self.w2 = s * jax.random.normal(ks[4], (hidden, latent_channels), jnp.float32)
        self.b2 = jnp.zeros((1, latent_channels), jnp.float32)

        self._pack_cache = {}

    def _time_proj(self, t):
        temb = timestep_embedding(t, self.time_emb_dim)
        return jnp.dot(temb, self.wt) + self.bt            # tiny (B, hidden)

    def _packed(self, kind, g):
        key = (kind, g)
        if key not in self._pack_cache:
            if kind == "img":
                # fold encoder into first MLP layer and decoder into second
                wa = self.enc_w @ self.w1
                ba = self.enc_b @ self.w1 + self.b1
                wb = self.w2 @ self.dec_w
                bb = self.b2 @ self.dec_w + self.dec_b
            else:                                          # latent-only path
                wa, ba, wb, bb = self.w1, self.b1, self.w2, self.b2
            self._pack_cache[key] = _pack_blockdiag(wa, ba, wb, bb, g)
        return self._pack_cache[key]

    def _batch_bias(self, packed_ba, t, g):
        """Fold the time projection into the first-layer bias, per batch."""
        tp = self._time_proj(t)                            # (B, hidden)
        bias_a = packed_ba + jnp.tile(tp, (1, g))          # (B, g*hidden)
        return bias_a[:, None, :].astype(jnp.float32)      # (B, 1, Nh)

    def _forward_impl(self, x, t, mlp_fn):
        if x.ndim == 4 and x.shape[1] == self.in_channels:
            # ---- image path: encode -> noise_pred_net -> decode (fused) ----
            B, C, H, W = x.shape
            h, w = H // 2, W // 2
            # patchify, packing all w patches of an image row into the lane
            # axis -> (B, h, w*C*4) lane-dense rows (128 lanes at defaults)
            x_rows = (x.reshape(B, C, h, 2, w, 2)
                       .transpose(0, 2, 4, 1, 3, 5)
                       .reshape(B, h, w * C * 4))
            wa, ba, wb, bb = self._packed("img", w)
            bias_a = self._batch_bias(ba, t, w)                       # (B,1,Nh)
            y = mlp_fn(x_rows, bias_a, wa, wb, bb)                    # (B,h,w*C*4)
            return (y.reshape(B, h, w, C, 2, 2)
                     .transpose(0, 3, 1, 4, 2, 5)
                     .reshape(B, C, H, W))
        else:
            # ---- latent path: noise_pred_net(x, t) only ----
            B, Cl, h, w = x.shape
            z_rows = x.transpose(0, 2, 3, 1).reshape(B, h, w * Cl)
            wa, ba, wb, bb = self._packed("lat", w)
            bias_a = self._batch_bias(ba, t, w)
            out = mlp_fn(z_rows, bias_a, wa, wb, bb)                  # (B,h,w*Cl)
            return out.reshape(B, h, w, Cl).transpose(0, 3, 1, 2)

    def forward(self, x, t):
        return self._forward_impl(x, t, pallas_fused_mlp)

    def forward_reference(self, x, t):
        return self._forward_impl(x, t, _ref_fused_mlp)

    # TODO(synk): sample() / training_step() involve the NoiseScheduler's
    # host-side timestep loop and RNG; only the forward hot path is a kernel.


if __name__ == "__main__":
    B, C, H = 2, 4, 16
    LATENT_C = 8
    model = LatentDiffusionModelPallas(latent_channels=LATENT_C, img_size=H,
                                       in_channels=C)

    key = jax.random.PRNGKey(0)
    kx, kt, kz = jax.random.split(key, 3)
    x = jax.random.normal(kx, (B, C, H, H), dtype=jnp.float32)
    t = jax.random.randint(kt, (B,), 0, 1000)

    # Image path: encode -> noise_pred -> decode, one fused Pallas kernel.
    out = model.forward(x, t)
    jax.block_until_ready(out)
    assert out.shape == (B, C, H, H), out.shape
    assert out.dtype == jnp.float32
    err = float(jnp.max(jnp.abs(out - model.forward_reference(x, t))))
    assert err < 5e-3, f"image-path mismatch vs reference: {err}"

    # Latent path: noise_pred_net(z, t) only (same fused kernel, no enc/dec).
    z = jax.random.normal(kz, (B, LATENT_C, H // 2, H // 2), dtype=jnp.float32)
    out_z = model.forward(z, t)
    jax.block_until_ready(out_z)
    assert out_z.shape == z.shape, out_z.shape
    err_z = float(jnp.max(jnp.abs(out_z - model.forward_reference(z, t))))
    assert err_z < 5e-3, f"latent-path mismatch vs reference: {err_z}"

    print("KERNEL_OK")
</pallas_src>

<mosaic_0001>
module attributes {stable_mosaic.version = 11 : i64} {
  func.func @_fused_mlp_kernel(%arg0: i32, %arg1: i32, %arg2: memref<1x8x128xf32, #tpu.memory_space<vmem>>, %arg3: memref<1x1x256xf32, #tpu.memory_space<vmem>>, %arg4: memref<128x256xbf16, #tpu.memory_space<vmem>>, %arg5: memref<256x128xbf16, #tpu.memory_space<vmem>>, %arg6: memref<1x128xf32, #tpu.memory_space<vmem>>, %arg7: memref<1x8x128xf32, #tpu.memory_space<vmem>>) attributes {dimension_semantics = [#tpu.dimension_semantics<parallel>, #tpu.dimension_semantics<parallel>], iteration_bounds = array<i64: 2, 1>, scalar_prefetch = 0 : i64, scratch_operands = 0 : i64, tpu.core_type = #tpu.core_type<tc>, window_params = [{transform_indices = @transform_0, window_bounds = array<i64: 1, 8, 128>}, {transform_indices = @transform_1, window_bounds = array<i64: 1, 1, 256>}, {pipeline_mode = #tpu.pipeline_mode<synchronous>, transform_indices = @transform_2, window_bounds = array<i64: 128, 256>}, {pipeline_mode = #tpu.pipeline_mode<synchronous>, transform_indices = @transform_3, window_bounds = array<i64: 256, 128>}, {pipeline_mode = #tpu.pipeline_mode<synchronous>, transform_indices = @transform_4, window_bounds = array<i64: 1, 128>}, {transform_indices = @transform_5, window_bounds = array<i64: 1, 8, 128>}]} {
    %c0 = arith.constant 0 : index
    %c0_0 = arith.constant 0 : index
    %c0_1 = arith.constant 0 : index
    %0 = vector.load %arg2[%c0, %c0_0, %c0_1] : memref<1x8x128xf32, #tpu.memory_space<vmem>>, vector<1x8x128xf32>
    %1 = vector.shape_cast %0 : vector<1x8x128xf32> to vector<8x128xf32>
    %2 = arith.truncf %1 : vector<8x128xf32> to vector<8x128xbf16>
    %c0_2 = arith.constant 0 : index
    %c0_3 = arith.constant 0 : index
    %3 = vector.load %arg4[%c0_2, %c0_3] : memref<128x256xbf16, #tpu.memory_space<vmem>>, vector<128x256xbf16>
    %cst = arith.constant dense<0.000000e+00> : vector<8x256xf32>
    %4 = tpu.matmul %2, %3, %cst {dimension_numbers = #tpu.dot_dimension_numbers<[1], [0], [0], [1], [0, 0, 1, 1], [], []>} : vector<8x128xbf16>, vector<128x256xbf16>, vector<8x256xf32> -> vector<8x256xf32>
    %c0_4 = arith.constant 0 : index
    %c0_5 = arith.constant 0 : index
    %c0_6 = arith.constant 0 : index
    %5 = vector.load %arg3[%c0_4, %c0_5, %c0_6] : memref<1x1x256xf32, #tpu.memory_space<vmem>>, vector<1x1x256xf32>
    %6 = vector.shape_cast %5 : vector<1x1x256xf32> to vector<1x256xf32>
    %7 = vector.broadcast %6 : vector<1x256xf32> to vector<8x256xf32>
    %8 = arith.addf %4, %7 : vector<8x256xf32>
    %9 = arith.negf %8 : vector<8x256xf32>
    %10 = math.exp %9 : vector<8x256xf32>
    %cst_7 = arith.constant 1.000000e+00 : f32
    %11 = vector.broadcast %cst_7 : f32 to vector<8x256xf32>
    %12 = arith.addf %11, %10 : vector<8x256xf32>
    %13 = arith.divf %11, %12 : vector<8x256xf32>
    %14 = arith.mulf %8, %13 : vector<8x256xf32>
    %15 = arith.truncf %14 : vector<8x256xf32> to vector<8x256xbf16>
    %c0_8 = arith.constant 0 : index
    %c0_9 = arith.constant 0 : index
    %16 = vector.load %arg5[%c0_8, %c0_9] : memref<256x128xbf16, #tpu.memory_space<vmem>>, vector<256x128xbf16>
    %cst_10 = arith.constant dense<0.000000e+00> : vector<8x128xf32>
    %17 = tpu.matmul %15, %16, %cst_10 {dimension_numbers = #tpu.dot_dimension_numbers<[1], [0], [0], [1], [0, 0, 1, 1], [], []>} : vector<8x256xbf16>, vector<256x128xbf16>, vector<8x128xf32> -> vector<8x128xf32>
    %c0_11 = arith.constant 0 : index
    %c0_12 = arith.constant 0 : index
    %18 = vector.load %arg6[%c0_11, %c0_12] : memref<1x128xf32, #tpu.memory_space<vmem>>, vector<1x128xf32>
    %19 = vector.broadcast %18 : vector<1x128xf32> to vector<8x128xf32>
    %20 = arith.addf %17, %19 : vector<8x128xf32>
    %c0_13 = arith.constant 0 : index
    %c0_14 = arith.constant 0 : index
    %c0_15 = arith.constant 0 : index
    %21 = vector.load %arg7[%c0_13, %c0_14, %c0_15] : memref<1x8x128xf32, #tpu.memory_space<vmem>>, vector<1x8x128xf32>
    %22 = vector.shape_cast %21 : vector<1x8x128xf32> to vector<8x128xf32>
    %23 = vector.shape_cast %20 : vector<8x128xf32> to vector<1x8x128xf32>
    tpu.vector_store %arg7[%c0_13, %c0_14, %c0_15], %23 {strides = array<i32>} : memref<1x8x128xf32, #tpu.memory_space<vmem>>, vector<1x8x128xf32>,
    return
  }
  func.func @transform_0(%arg0: i32, %arg1: i32) -> (i32, i32, i32) {
    %c0_i32 = arith.constant 0 : i32
    %c0_i32_0 = arith.constant 0 : i32
    return %arg0, %arg1, %c0_i32 : i32, i32, i32
  }
  func.func @transform_1(%arg0: i32, %arg1: i32) -> (i32, i32, i32) {
    %c0_i32 = arith.constant 0 : i32
    %c0_i32_0 = arith.constant 0 : i32
    %c0_i32_1 = arith.constant 0 : i32
    return %arg0, %c0_i32, %c0_i32_0 : i32, i32, i32
  }
  func.func @transform_2(%arg0: i32, %arg1: i32) -> (i32, i32) {
    %c0_i32 = arith.constant 0 : i32
    %c0_i32_0 = arith.constant 0 : i32
    %c0_i32_1 = arith.constant 0 : i32
    return %c0_i32, %c0_i32_0 : i32, i32
  }
  func.func @transform_3(%arg0: i32, %arg1: i32) -> (i32, i32) {
    %c0_i32 = arith.constant 0 : i32
    %c0_i32_0 = arith.constant 0 : i32
    %c0_i32_1 = arith.constant 0 : i32
    return %c0_i32, %c0_i32_0 : i32, i32
  }
  func.func @transform_4(%arg0: i32, %arg1: i32) -> (i32, i32) {
    %c0_i32 = arith.constant 0 : i32
    %c0_i32_0 = arith.constant 0 : i32
    %c0_i32_1 = arith.constant 0 : i32
    return %c0_i32, %c0_i32_0 : i32, i32
  }
  func.func @transform_5(%arg0: i32, %arg1: i32) -> (i32, i32, i32) {
    %c0_i32 = arith.constant 0 : i32
    %c0_i32_0 = arith.constant 0 : i32
    return %arg0, %arg1, %c0_i32 : i32, i32, i32
  }
}

</mosaic_0001>

<bundles_post_ra>
// kernel: tpu_custom_call.1
= control target key start
LH: loop header
LB: loop body
LE: loop exit
PB: predicated region body
PF: predicated region fallthrough
CT: control target
= control target key end

     0   :  { %s1579_s0 = inlined_call_operand.hbm [shape: f32[2,8,128], index: 0, kind: input, shape index: {}]   ;;  %s1580_s1 = inlined_call_operand.hbm [shape: f32[2,1,256], index: 1, kind: input, shape index: {}]   ;;  %s1581_s2 = inlined_call_operand.hbm [shape: bf16[128,256], index: 2, kind: input, shape index: {}]   ;;  %s1582_s3 = inlined_call_operand.hbm [shape: bf16[256,128], index: 3, kind: input, shape index: {}]   ;;  %s1583_s4 = inlined_call_operand.vmem [shape: f32[1,128], index: 4, kind: input, shape index: {}]   ;;  %s1584_s5 = inlined_call_operand.hbm [shape: f32[2,8,128], index: 5, kind: output, shape index: {}]  }
   0x1   :  { %1589 = sst [smem:[#allocation16_spill]] %s1579_s0 }
   0x2   :  { %1590 = sst [smem:[#allocation17_spill]] %s1581_s2 }
   0x3   :  { %1591 = sst [smem:[#allocation18_spill]] %s1582_s3 }
   0x4   :  { %10 = vsyncpa [#allocation3], 0 }
   0x5   :  { %12 = vsyncpa [#allocation3 + $0x1], 0 }
   0x6   :  { %13 = vsyncpa [#allocation6], 0 }
   0x7   :  { %15 = vsyncpa [#allocation6 + $0x1], 0 }
   0x8   :  { %16 = vsyncpa [#allocation9], 0 }
   0x9   :  { %17 = vsyncpa [#allocation4], 0 }
   0xa   :  { %19 = vsyncpa [#allocation4 + $0x1], 0  ;;  %s1277_s18 = smov 0   ;;  %s1279_s19 = smov 0  }
   0xb   :  { %s1281_s20 = smov 0   ;;  %s1283_s21 = smov 0  }
   0xc   :  { %s1285_s22 = smov 0   ;;  %s1287_s23 = smov 0  }
   0xd LB: > { %s1308_s24 = sadd.s32 4294967295, %s1235_s23   ;;  %s806_s25 = sadd.s32 4294967294, %s1235_s23   ;;  %s1235_s23 = sphi %s1287_s23, %s25_s23   ;;  %s1231_s22 = sphi %s1285_s22, %s1616_s22   ;;  %s1227_s21 = sphi %s1283_s21, %s1615_s21   ;;  %s1223_s20 = sphi %s1281_s20, %s1614_s20   ;;  %s1219_s19 = sphi %s1279_s19, %s1613_s19   ;;  %s1215_s18 = sphi %s1277_s18, %s1612_s18  }
   0xe   : > { %p59_p0 = scmp.ne.s32.totalorder %s1219_s19, %s1215_s18  ;;  %p1585_p1 = scmp.eq.s32.totalorder %s1308_s24, 0 }
   0xf   : > { %p180_p3 = scmp.eq.s32.totalorder %s806_s25, 1  ;;  %p807_p5 = scmp.ge.s32.totalorder %s1235_s23, 1 }
  0x10   : > { %p1317_p4 = por %p1585_p1, %p59_p0  ;;  %p187_p7 = scmp.lt.s32.totalorder %s1235_s23, 3 }
  0x11   : > { %p1322_p6 = por %p180_p3, %p59_p0  ;;  %s1237_s29 = smov [#allocation7]  }
  0x12   : > { %s1592_s26 = scalar_select %p1317_p4, 1, 0 }
  0x13   : > { %s1593_s27 = scalar_select %p1322_p6, 1, 0 }
  0x14   : > { %p1327_p8 = pnand %p807_p5, %p187_p7  ;;  %s199_s30 = sshll.u32 %s1237_s29, 4  ;;  %s1331_s30 = int_to_ptr.vmem [resolvable:$true] %s199_s30 }
  0x15   : > { %s1238_s7 = smov [#allocation8]   ;;  %s1596_s2 = sld [smem:[#allocation17_spill]] }
  0x16   : > { %s1594_s28 = scalar_select %p1327_p8, 1, 0 }
  0x17   : > { %p898_p9 = pneg %p1327_p8  ;;  %s212_s8 = sshll.u32 %s1238_s7, 4  ;;  %s1342_s8 = int_to_ptr.vmem [resolvable:$true] %s212_s8 }
  0x19   : > { %p1338_p11 = pnand %p898_p9, %p1585_p1 }
  0x1b   : > { %s1025_s11 = scalar_lea.hbm %s1596_s2, 2048  ;;  %p1027_p13 = pneg %p1338_p11 }
  0x1c   : > { %p1026_p12 = scmp.ne.s32.totalorder %s1596_s2, %s1025_s11  ;;  %p1032_p5 = scmp.lt.u32.totalorder %s1025_s11, %s1596_s2 }
  0x1e   : > { %p1028_p0 = pnand %p1027_p13, %p1026_p12 }
  0x20   : > { %p1029_p3 = pneg %p1028_p0 }
  0x22   : > { %p1034_p7 = pnand %p1032_p5, %p1029_p3 }
  0x24   : > { %1037 = shalt.err (!%p1034_p7)
}
  0x25   : > { %s1038_s16 = scalar_lea.vmem %s1331_s30, 2048  ;;  %p1046_p2 = scmp.lt.s32.totalorder %s1331_s30, %s1331_s30 }
  0x26   : > { %p1039_p9 = scmp.ne.s32.totalorder %s1331_s30, %s1038_s16  ;;  %p1047_p12 = scmp.lt.s32.totalorder %s1038_s16, %s1038_s16 }
  0x28   : > { %p1041_p10 = pnand %p1039_p9, %p1027_p13  ;;  %p1048_p0 = por %p1047_p12, %p1046_p2 }
  0x2a   : > { %p1042_p1 = pneg %p1041_p10 }
  0x2c   : > { %p1049_p6 = pnand %p1048_p0, %p1042_p1 }
  0x2e   : > { %1052 = shalt.err (!%p1049_p6)
}
  0x2f   : > { %s1239_s17 = smov 128   ;;  %s1240_s25 = smov 8  }
  0x30   : > { %901 = dma.hbm_to_vmem [thread:$0]  (!%p1338_p11), %s1596_s2, 2048, %s1331_s30, [#allocation6], %s1239_s17, %s1239_s17, %s1240_s25  }
  0x31   : > { %s1597_s3 = sld [smem:[#allocation18_spill]] }
  0x37   : > { %s1053_s11 = scalar_lea.hbm %s1597_s3, 2048 }
  0x38   : > { %p1054_p2 = scmp.ne.s32.totalorder %s1597_s3, %s1053_s11  ;;  %p1060_p10 = scmp.lt.u32.totalorder %s1053_s11, %s1597_s3 }
  0x3a   : > { %p1056_p1 = pnand %p1054_p2, %p1027_p13 }
  0x3c   : > { %p1057_p6 = pneg %p1056_p1 }
  0x3e   : > { %p1062_p3 = pnand %p1060_p10, %p1057_p6 }
  0x40   : > { %1065 = shalt.err (!%p1062_p3)
}
  0x41   : > { %s1066_s30 = scalar_lea.vmem %s1342_s8, 2048  ;;  %p1074_p12 = scmp.lt.s32.totalorder %s1342_s8, %s1342_s8 }
  0x42   : > { %p1067_p5 = scmp.ne.s32.totalorder %s1342_s8, %s1066_s30  ;;  %p1075_p0 = scmp.lt.s32.totalorder %s1066_s30, %s1066_s30 }
  0x44   : > { %p1069_p7 = pnand %p1067_p5, %p1027_p13  ;;  %p1076_p2 = por %p1075_p0, %p1074_p12 }
  0x46   : > { %p1070_p9 = pneg %p1069_p7 }
  0x48   : > { %p1077_p1 = pnand %p1076_p2, %p1070_p9 }
  0x4a   : > { %1080 = shalt.err (!%p1077_p1)
}
  0x4b   : > { %s1241_s16 = smov 64   ;;  %s1242_s17 = smov 4  }
  0x4c   : > { %904 = dma.hbm_to_vmem [thread:$0]  (!%p1338_p11), %s1597_s3, 2048, %s1342_s8, [#allocation9], %s1241_s16, %s1241_s16, %s1242_s17  }
  0x4d   : > { %s37_s7 = sadd.s32 1, %s1231_s22  ;;  %s46_s9 = sadd.s32 1, %s1223_s20 }
  0x4e   : > { %p39_p13 = scmp.ge.s32.totalorder %s37_s7, 2  ;;  %p53_p6 = scmp.ne.s32.totalorder %s1223_s20, %s1219_s19 }
  0x4f   : > { %p54_p10 = scmp.eq.s32.totalorder %s1235_s23, 0  ;;  %p918_p3 = scmp.lt.s32.totalorder %s1235_s23, 2 }
  0x50   : > { %s1618_s7 = smov (%p39_p13, %s37_s7), 0  ;;  %p1598_p7 = scmp.eq.s32.totalorder %s1308_s24, 1 }
  0x51   : > { %p55_p5 = por %p54_p10, %p53_p6  ;;  %s41_s10 = ssub.s32 %s1231_s22, %s1618_s7 }
  0x52   : > { %p1406_p9 = por %p1598_p7, %p53_p6  ;;  %s1413_s11 = sand.u32 1, %s1223_s20  }
  0x53   : > { %p44_p11 = scmp.eq.s32.totalorder %s41_s10, 0  ;;  %s811_s8 = sshll.u32 %s1413_s11, 3 }
  0x54   : > { %s1599_s6 = scalar_select %p1406_p9, 1, 0 }
  0x55   : > { %s812_s12 = sshll.u32 %s1231_s22, 7  ;;  %s1600_s0 = sld [smem:[#allocation16_spill]] }
  0x56   : > { %s1418_s13 = scalar_select %p44_p11, %s1223_s20, %s46_s9  }
  0x57   : > { %s233_s16 = scalar_lea.vmem [#allocation2], %s811_s8  ;;  %p1427_p12 = pnand %p918_p3, %p55_p5 }
  0x58   : > { %s241_s17 = sshll.u32 %s233_s16, 4  ;;  %s230_s9 = scalar_lea.sflag [#allocation3], %s1413_s11  ;;  %s1431_s17 = int_to_ptr.vmem [resolvable:$true] %s241_s17 }
  0x59   : > { %p1083_p2 = pneg %p1427_p12 }
  0x5b   : > { %s1423_s30 = scalar_lea.hbm %s1600_s0, %s812_s12  ;;  %s1086_s14 = scalar_lea.hbm %s1600_s0, 256 }
  0x5c   : > { %s1081_s10 = scalar_lea.hbm %s1423_s30, 128  ;;  %p1087_p6 = scmp.lt.u32.totalorder %s1423_s30, %s1600_s0 }
  0x5d   : > { %p1082_p0 = scmp.ne.s32.totalorder %s1423_s30, %s1081_s10  ;;  %p1088_p10 = scmp.lt.u32.totalorder %s1086_s14, %s1081_s10 }
  0x5e   : > { %p1090_p5 = scmp.lt.u32.totalorder %s1081_s10, %s1423_s30 }
  0x5f   : > { %p1084_p1 = pnand %p1083_p2, %p1082_p0  ;;  %p1089_p3 = por %p1088_p10, %p1087_p6 }
  0x61   : > { %p1085_p13 = pneg %p1084_p1  ;;  %p1091_p7 = por %p1090_p5, %p1089_p3 }
  0x63   : > { %p1092_p11 = pnand %p1091_p7, %p1085_p13 }
  0x65   : > { %1095 = shalt.err (!%p1092_p11)
}
  0x66   : > { %s1096_s29 = scalar_lea.vmem %s1431_s17, 128  ;;  %s1243_s8 = smov [#allocation2]  }
  0x67   : > { %p1097_p0 = scmp.ne.s32.totalorder %s1431_s17, %s1096_s29  ;;  %s1101_s12 = sshll.u32 %s1243_s8, 4  ;;  %s1102_s12 = int_to_ptr.vmem [resolvable:$false] %s1101_s12 }
  0x68   : > { %s1103_s15 = scalar_lea.vmem %s1102_s12, 256  ;;  %p1104_p4 = scmp.lt.s32.totalorder %s1431_s17, %s1102_s12 }
  0x69   : > { %p1099_p1 = pnand %p1097_p0, %p1083_p2  ;;  %p1105_p6 = scmp.lt.s32.totalorder %s1103_s15, %s1096_s29 }
  0x6b   : > { %p1100_p9 = pneg %p1099_p1  ;;  %p1106_p10 = por %p1105_p6, %p1104_p4 }
  0x6d   : > { %p1107_p3 = pnand %p1106_p10, %p1100_p9 }
  0x6f   : > { %1110 = shalt.err (!%p1107_p3)
}
  0x70   : > { %908 = dma.hbm_to_vmem [thread:$0]  (!%p1427_p12), %s1423_s30, 128, %s1431_s17, %s230_s9  }
  0x71   : > { %s813_s10 = sshll.u32 %s1413_s11, 1  ;;  %s861_s14 = sshll.u32 %s1231_s22, 5 }
  0x72   : > { %s1465_s0 = scalar_lea.hbm %s1580_s1, %s861_s14  ;;  %s252_s29 = scalar_lea.vmem [#allocation5], %s813_s10 }
  0x73   : > { %s260_s12 = sshll.u32 %s252_s29, 4  ;;  %s1602_s15 = sand.u32 1, %s1235_s23   ;;  %s261_s12 = int_to_ptr.vmem [resolvable:$true] %s260_s12 }
  0x74   : > { %s249_s2 = scalar_lea.sflag [#allocation6], %s1602_s15  ;;  %s1111_s3 = scalar_lea.hbm %s1465_s0, 32 }
  0x75   : > { %p1112_p4 = scmp.ne.s32.totalorder %s1465_s0, %s1111_s3  ;;  %s1116_s17 = scalar_lea.hbm %s1580_s1, 64 }
  0x76   : > { %p1117_p5 = scmp.lt.u32.totalorder %s1465_s0, %s1580_s1  ;;  %p1118_p7 = scmp.lt.u32.totalorder %s1116_s17, %s1111_s3 }
  0x77   : > { %p1114_p9 = pnand %p1112_p4, %p1083_p2  ;;  %p1120_p0 = scmp.lt.u32.totalorder %s1111_s3, %s1465_s0 }
  0x78   : > { %p1119_p11 = por %p1118_p7, %p1117_p5 }
  0x79   : > { %p1115_p13 = pneg %p1114_p9 }
  0x7a   : > { %p1121_p1 = por %p1120_p0, %p1119_p11 }
  0x7c   : > { %p1122_p6 = pnand %p1121_p1, %p1115_p13 }
  0x7e   : > { %1125 = shalt.err (!%p1122_p6)
}
  0x7f   : > { %s1126_s10 = scalar_lea.vmem %s261_s12, 32  ;;  %s1244_s16 = smov [#allocation5]  }
  0x80   : > { %p1127_p10 = scmp.ne.s32.totalorder %s261_s12, %s1126_s10  ;;  %s1131_s8 = sshll.u32 %s1244_s16, 4  ;;  %s1132_s8 = int_to_ptr.vmem [resolvable:$false] %s1131_s8 }
  0x81   : > { %s1133_s29 = scalar_lea.vmem %s1132_s8, 64  ;;  %p1134_p9 = scmp.lt.s32.totalorder %s261_s12, %s1132_s8 }
  0x82   : > { %p1129_p3 = pnand %p1127_p10, %p1083_p2  ;;  %p1135_p8 = scmp.lt.s32.totalorder %s1133_s29, %s1126_s10 }
  0x84   : > { %p1130_p4 = pneg %p1129_p3  ;;  %p1136_p5 = por %p1135_p8, %p1134_p9 }
  0x86   : > { %p1137_p7 = pnand %p1136_p5, %p1130_p4 }
  0x88   : > { %1140 = shalt.err (!%p1137_p7)
}
  0x89   : > { %911 = dma.hbm_to_vmem [thread:$0]  (!%p1427_p12), %s1465_s0, 32, %s261_s12, %s249_s2  }
  0x8a   : > { %p1603_p13 = scmp.ne.s32.totalorder %s1594_s28, 0 }
  0x8b   : > { %s1491_s3 = sand.u32 (!%p1603_p13), 1, %s1219_s19   ;;  %p1604_p8 = scmp.ne.s32.totalorder (!%p1603_p13), %s1592_s26, 0 }
  0x8c   : > { %269 = sbr.rel (%p1603_p13) target bundleno = 668 (0x29c), region = 40  ;;  %s817_s15 = sshll.u32 (!%p1603_p13), %s1491_s3, 3 }
  0x8d   : > { %s272_s11 = scalar_lea.sflag (!%p1603_p13), [#allocation3], %s1491_s3  ;;  %s1497_s30 = scalar_lea.vmem (!%p1603_p13), [#allocation2], %s817_s15 }
  0x93   : > { %1194 = dma.done.wait (%p1604_p8), %s272_s11, 128  }
  0x94   : > { %1196 = vsyncadd (%p1604_p8), %s272_s11, 4294967168  ;;  %s280_s0 = sand.u32 1, %s1308_s24   ;;  %s818_s2 = sshll.u32 %s1491_s3, 1 }
  0x95   : > { %s281_s28 = scalar_lea.sflag [#allocation6], %s280_s0  ;;  %s1505_s25 = scalar_lea.vmem [#allocation5], %s818_s2 }
  0x96   : > { %1198 = dma.done.wait (%p1604_p8), %s281_s28, 32  }
  0x97   : > { %1200 = vsyncadd (%p1604_p8), %s281_s28, 4294967264  ;;  %p1605_p12 = scmp.eq.s32.totalorder %s1308_s24, 0 }
  0x99   : > { %1202 = dma.done.wait (%p1605_p12), [#allocation6], 2048   ;;  %p1606_p2 = pmov %p1605_p12 }
  0x9b   : > { %1204 = vsyncadd (%p1606_p2), [#allocation6], 4294965248  ;;  %p1607_p11 = pmov %p1606_p2 }
  0x9c   : > { %p1608_p0 = pmov %p1606_p2 }
  0x9d   : > { %1206 = dma.done.wait (%p1607_p11), [#allocation9], 2048  }
  0x9e   : > { %1208 = vsyncadd (%p1608_p0), [#allocation9], 4294965248  ;;  %v1245_v0 = vmov 0   ;;  %v977_v1 = vld [vmem:[#allocation7 + $0x4] ss:$8 sps:$4 sm:$0xff]   ;;  %v1005_v23 = vld [vmem:[#allocation8 + $0x50] sm:$0xff]   ;;  %v345_v35 = vlaneseq }
  0x9f   : > { %467 = vmatprep.mubr.bf16.mxu0 %v1245_v0  ;;  %v979_v2 = vld [vmem:[#allocation7] ss:$8 sps:$4 sm:$0xff]   ;;  %435 = vmatprep.subr.bf16.mxu0 %v977_v1  ;;  %v980_v3 = vld [vmem:[#allocation7 + $0x14] ss:$8 sps:$4 sm:$0xff]   ;;  %v982_v4 = vld [vmem:[#allocation7 + $0x10] ss:$8 sps:$4 sm:$0xff]  }
  0xa0   : > { %436 = vmatpush1.bf16.msra.mxu0 %v979_v2  ;;  %v983_v5 = vld [vmem:[#allocation7 + $0x24] ss:$8 sps:$4 sm:$0xff]   ;;  %v985_v6 = vld [vmem:[#allocation7 + $0x20] ss:$8 sps:$4 sm:$0xff]   ;;  %v986_v7 = vld [vmem:[#allocation7 + $0x34] ss:$8 sps:$4 sm:$0xff]  }
  0xa1   : > { %437 = vmatprep.subr.bf16.mxu0 %v980_v3  ;;  %v988_v8 = vld [vmem:[#allocation7 + $0x30] ss:$8 sps:$4 sm:$0xff]   ;;  %v989_v9 = vld [vmem:[#allocation7 + $0x44] ss:$8 sps:$4 sm:$0xff]   ;;  %v991_v10 = vld [vmem:[#allocation7 + $0x40] ss:$8 sps:$4 sm:$0xff]  }
  0xa2   : > { %v992_v11 = vld [vmem:[#allocation7 + $0x54] ss:$8 sps:$4 sm:$0xff]   ;;  %v994_v12 = vld [vmem:[#allocation7 + $0x50] ss:$8 sps:$4 sm:$0xff]   ;;  %v995_v13 = vld [vmem:[#allocation7 + $0x64] ss:$8 sps:$4 sm:$0xff]  }
  0xa3   : > { %v997_v14 = vld [vmem:[#allocation7 + $0x60] ss:$8 sps:$4 sm:$0xff]   ;;  %v998_v15 = vld [vmem:[#allocation7 + $0x74] ss:$8 sps:$4 sm:$0xff]   ;;  %v1000_v16 = vld [vmem:[#allocation7 + $0x70] ss:$8 sps:$4 sm:$0xff]  }
  0xa4   : > { %438 = vmatpush1.bf16.msra.mxu0 %v982_v4  ;;  %v325_v17 = vld [vmem:[%s1497_s30] sm:$0xff]  ;;  %v1001_v19 = vld [vmem:[#allocation8 + $0x40] sm:$0xff]   ;;  %v346_v36 = vshrl.u32 %v345_v35, 7  ;;  %v343_v38 = vld [vmem:[%s1505_s25] sm:$0x3]  ;;  %s858_s12 = sshll.u32 %s1227_s21, 7 }
  0xa5   : > { %439 = vmatprep.subr.bf16.mxu0 %v983_v5  ;;  %v326_v18 = vpack.c.bf16 %v325_v17, %v325_v17  ;;  %v1002_v20 = vld [vmem:[#allocation8] sm:$0xff]   ;;  %862 = vmatprep.subr.bf16.mxu1 %v1001_v19  ;;  %v1003_v21 = vld [vmem:[#allocation8 + $0x48] sm:$0xff]   ;;  %v1006_v24 = vld [vmem:[#allocation8 + $0x10] sm:$0xff]   ;;  %s323_s17 = scalar_lea.vmem [#allocation10], %s817_s15  ;;  %s1530_s16 = scalar_lea.hbm %s1584_s5, %s858_s12 }
  0xa6   : > { %863 = vmatpush3.bf16.msra.mxu1 %v1002_v20  ;;  %v1004_v22 = vld [vmem:[#allocation8 + $0x8] sm:$0xff]   ;;  %v1007_v25 = vld [vmem:[#allocation8 + $0x58] sm:$0xff]   ;;  %v1009_v27 = vld [vmem:[#allocation8 + $0x60] sm:$0xff]   ;;  %v347_v37 = vsub.s32 0, %v346_v36  ;;  %v351_v39 = vsub.s32 1, %v346_v36  ;;  %s683_s9 = sshll.u32 %s323_s17, 4  ;;  %s1532_s9 = int_to_ptr.vmem [resolvable:$true] %s683_s9 }
  0xa7   : > { %864 = vmatprep.subr.bf16.mxu1 %v1003_v21  ;;  %v1008_v26 = vld [vmem:[#allocation8 + $0x18] sm:$0xff]   ;;  %v1010_v28 = vld [vmem:[#allocation8 + $0x20] sm:$0xff]   ;;  %v1011_v29 = vld [vmem:[#allocation8 + $0x68] sm:$0xff]   ;;  %s669_s8 = scalar_lea.sflag [#allocation4], %s1491_s3  ;;  %s1141_s21 = scalar_lea.vmem %s1532_s9, 128 }
  0xa8   : > { %440 = vmatpush1.bf16.msra.mxu0 %v985_v6  ;;  %v1012_v30 = vld [vmem:[#allocation8 + $0x28] sm:$0xff]   ;;  %v1013_v31 = vld [vmem:[#allocation8 + $0x70] sm:$0xff]   ;;  %v1015_v33 = vld [vmem:[#allocation8 + $0x78] sm:$0xff]   ;;  %v348_v40 = vrot.slane %v343_v38, %v347_v37  ;;  %v352_v41 = vrot.slane %v343_v38, %v351_v39  ;;  %p1142_p1 = scmp.ne.s32.totalorder %s1532_s9, %s1141_s21  ;;  %p1609_p6 = scmp.ne.s32.totalorder %s1599_s6, 0 }
  0xa9   : > { %441 = vmatprep.subr.bf16.mxu0 %v986_v7  ;;  %v1014_v32 = vld [vmem:[#allocation8 + $0x30] sm:$0xff]   ;;  %v1016_v34 = vld [vmem:[#allocation8 + $0x38] sm:$0xff]   ;;  %v840_v61 = vld [vmem:[%s1583_s4] ss:$0 sm:$0xff]  ;;  %s1246_s29 = smov [#allocation10]  }
  0xaa   : > { %865 = vmatpush3.bf16.msra.mxu1 %v1004_v22  ;;  %p1143_p10 = pnand %p1142_p1, %p1609_p6  ;;  %s1145_s15 = sshll.u32 %s1246_s29, 4  ;;  %s1146_s15 = int_to_ptr.vmem [resolvable:$false] %s1145_s15 }
  0xab   : > { %866 = vmatprep.subr.bf16.mxu1 %v1005_v23  ;;  %s1147_s11 = scalar_lea.vmem %s1146_s15, 256  ;;  %p1148_p4 = scmp.lt.s32.totalorder %s1532_s9, %s1146_s15 }
  0xac   : > { %442 = vmatpush1.bf16.msra.mxu0 %v988_v8  ;;  %p1144_p3 = pneg %p1143_p10  ;;  %p1149_p9 = scmp.lt.s32.totalorder %s1147_s11, %s1141_s21 }
  0xad   : > { %443 = vmatprep.subr.bf16.mxu0 %v989_v9 }
  0xae   : > { %867 = vmatpush3.bf16.msra.mxu1 %v1006_v24  ;;  %p1150_p5 = por %p1149_p9, %p1148_p4 }
  0xaf   : > { %868 = vmatprep.subr.bf16.mxu1 %v1007_v25 }
  0xb0   : > { %444 = vmatpush1.bf16.msra.mxu0 %v991_v10  ;;  %p1151_p7 = pnand %p1150_p5, %p1144_p3 }
  0xb1   : > { %445 = vmatprep.subr.bf16.mxu0 %v992_v11 }
  0xb2   : > { %869 = vmatpush3.bf16.msra.mxu1 %v1008_v26 }
  0xb3   : > { %870 = vmatprep.subr.bf16.mxu1 %v1009_v27 }
  0xb4   : > { %446 = vmatpush1.bf16.msra.mxu0 %v994_v12 }
  0xb5   : > { %447 = vmatprep.subr.bf16.mxu0 %v995_v13 }
  0xb6   : > { %871 = vmatpush3.bf16.msra.mxu1 %v1010_v28 }
  0xb7   : > { %872 = vmatprep.subr.bf16.mxu1 %v1011_v29 }
  0xb8   : > { %448 = vmatpush1.bf16.msra.mxu0 %v997_v14 }
  0xb9   : > { %449 = vmatprep.subr.bf16.mxu0 %v998_v15 }
  0xba   : > { %873 = vmatpush3.bf16.msra.mxu1 %v1012_v30 }
  0xbb   : > { %874 = vmatprep.subr.bf16.mxu1 %v1013_v31 }
  0xbc   : > { %450 = vmatpush1.bf16.msra.mxu0 %v1000_v16 }
  0xbe   : > { %875 = vmatpush3.bf16.msra.mxu1 %v1014_v32 }
  0xbf   : > { %468 = vmatmul.mubr.bf16.vlgmr.msra.gmra.mrb[0].mxu0 %v326_v18  ;;  %876 = vmatprep.subr.bf16.mxu1 %v1015_v33 }
  0xc2   : > { %877 = vmatpush3.bf16.msra.mxu1 %v1016_v34 }
 0x192   : > { %v469_v42 = vpop.f32.mrb[0].mxu0 }
 0x193   : > { %v470_v43 = vadd.f32 %v469_v42, %v348_v40  ;;  %v471_v44 = vpop.f32.mrb[1].mxu0 }
 0x194   : > { %v472_v45 = vadd.f32 %v471_v44, %v352_v41  ;;  %v473_v46 = vpop.f32.mrb[2].mxu0 }
 0x195   : > { %v838_v47 = vmul.f32 -1.442695, %v470_v43  ;;  %v474_v48 = vpop.f32.mrb[3].mxu0 }
 0x196   : > { %v839_v49 = vmul.f32 -1.442695, %v472_v45 }
 0x197   : > { %1017 = vpow2.f32 %v838_v47 }
 0x198   : > { %1019 = vpow2.f32 %v839_v49 }
 0x1a1   : > { %v1018_v50 = vpop.eup %1017 }
 0x1a2   : > { %v1020_v51 = vpop.eup %1019  ;;  %v482_v52 = vadd.f32 1.0, %v1018_v50 }
 0x1a3   : > { %v483_v53 = vadd.f32 1.0, %v1020_v51 }
 0x1a4   : > { %1021 = vrcp.f32 %v482_v52 }
 0x1a5   : > { %1023 = vrcp.f32 %v483_v53 }
 0x1ae   : > { %v1022_v54 = vpop.eup %1021 }
 0x1af   : > { %v1024_v55 = vpop.eup %1023  ;;  %v488_v56 = vmul.f32 %v1022_v54, %v470_v43 }
 0x1b0   : > { %v489_v57 = vmul.f32 %v1024_v55, %v472_v45 }
 0x1b1   : > { %v490_v59 = vpack.c.bf16 %v488_v56, %v488_v56 }
 0x1b2   : > { %v491_v58 = vpack.c.bf16 %v489_v57, %v489_v57 }
 0x1b4   : > { %659 = vmatprep.mubr.bf16.mxu1 %v491_v58 }
 0x1b5   : > { %660 = vmatmul.mubr.bf16.vlgmr.msra.gmra.mrb[0].mxu1 %v490_v59 }
 0x288   : > { %v878_v60 = vpop.f32.mrb[0].mxu1 }
 0x289   : > { %v879_v62 = vpop.f32.mrb[1].mxu1 }
 0x28a   : > { %v880_v63 = vadd.f32 %v879_v62, %v878_v60  ;;  %v881_v0 = vpop.f32.mrb[2].mxu1 }
 0x28b   : > { %v882_v1 = vpop.f32.mrb[3].mxu1 }
 0x28c   : > { %v662_v2 = vadd.f32 %v880_v63, %v840_v61 }
 0x28e   : > { %667 = vst [vmem:[%s323_s17] sm:$0xff] %v662_v2 }
 0x28f   : > { %1154 = shalt.err (!%p1151_p7)
}
 0x290   : > { %s1155_s3 = scalar_lea.hbm %s1530_s16, 128  ;;  %s1159_s2 = scalar_lea.hbm %s1584_s5, 256 }
 0x291   : > { %p1156_p13 = scmp.ne.s32.totalorder %s1530_s16, %s1155_s3  ;;  %p1160_p2 = scmp.lt.u32.totalorder %s1530_s16, %s1584_s5 }
 0x292   : > { %p1161_p11 = scmp.lt.u32.totalorder %s1159_s2, %s1155_s3  ;;  %p1163_p1 = scmp.lt.u32.totalorder %s1155_s3, %s1530_s16 }
 0x293   : > { %p1157_p8 = pnand %p1156_p13, %p1609_p6 }
 0x294   : > { %p1162_p0 = por %p1161_p11, %p1160_p2 }
 0x295   : > { %p1158_p12 = pneg %p1157_p8 }
 0x296   : > { %p1164_p10 = por %p1163_p1, %p1162_p0 }
 0x298   : > { %p1165_p3 = pnand %p1164_p10, %p1158_p12 }
 0x29a   : > { %1168 = shalt.err (!%p1165_p3)
}
 0x29b   : > { %896 = dma.vmem_to_hbm [thread:$0]  (%p1609_p6), %s1532_s9, 128, %s1530_s16, %s669_s8  }
 0x29c PF: > { %s695_s24 = sand.u32 1, %s1215_s18   ;;  %p1610_p4 = scmp.ne.s32.totalorder %s1593_s27, 0 }
 0x29d   : > { %p1611_p9 = scmp.ge.s32.totalorder %s1235_s23, 2  ;;  %s696_s26 = scalar_lea.sflag [#allocation4], %s695_s24 }
 0x29f   : > { %p913_p5 = pnand %p1611_p9, %p1610_p4 }
 0x2a1   : > { %1210 = dma.done.wait (!%p913_p5), %s696_s26, 128  }
 0x2a2   : > { %1212 = vsyncadd (!%p913_p5), %s696_s26, 4294967168  ;;  %s25_s23 = sadd.s32 1, %s1235_s23   ;;  %s1612_s18 = smov %s1219_s19 }
 0x2a3   : > { %p22_p7 = scmp.ge.s32.totalorder %s25_s23, 4   ;;  %s1613_s19 = smov %s1223_s20 }
 0x2a4   : > { %s1614_s20 = smov %s1418_s13  ;;  %s1615_s21 = smov %s1231_s22 }
 0x2a5   : > { %s1616_s22 = smov %s1618_s7  ;;  %24 = sbr.rel (!%p22_p7) target bundleno = 13 (0xd), region = 106 }
 0x2ac   :  { %701 = vsyncpa [#allocation3], 1 }
 0x2ad   :  { %703 = vsyncpa [#allocation3 + $0x1], 1 }
 0x2ae   :  { %704 = vsyncpa [#allocation6], 1 }
 0x2af   :  { %706 = vsyncpa [#allocation6 + $0x1], 1 }
 0x2b0   :  { %707 = vsyncpa [#allocation9], 1 }
 0x2b1   :  { %708 = vsyncpa [#allocation4], 1 }
 0x2b2   :  { %710 = vsyncpa [#allocation4 + $0x1], 1 }

</bundles_post_ra>
